<compile_context>
chip_gen: v5e
topology: v5e:2x2
jax: 0.10.0
libtpu: 0.0.40
codegen_flags: <defaults>
</compile_context>

<pallas_src>
import math
from functools import partial

import jax
import jax.numpy as jnp
from jax.experimental import pallas as pl
from jax.experimental.pallas import tpu as pltpu

EPS = 1e-4
_NEG_BIG = -1e30  # effectively -inf for masking; exp() underflows to 0.


def _round_up(x, m):
    return ((x + m - 1) // m) * m


# ----------------------------------------------------------------------------
# Parameter init (deterministic): gaussian_orthogonal_random_matrix in JAX.
# QR happens once at init time in plain JAX (glue), not in the kernel.
# ----------------------------------------------------------------------------
def gaussian_orthogonal_random_matrix(key, nb_rows, nb_columns, scaling=0):
    nb_full_blocks = nb_rows // nb_columns
    keys = jax.random.split(key, nb_full_blocks + 2)
    blocks = []
    for i in range(nb_full_blocks):
        g = jax.random.normal(keys[i], (nb_columns, nb_columns), dtype=jnp.float32)
        q_mat, _ = jnp.linalg.qr(g)
        blocks.append(q_mat.T)
    remaining = nb_rows - nb_full_blocks * nb_columns
    if remaining > 0:
        g = jax.random.normal(keys[nb_full_blocks], (nb_columns, nb_columns),
                              dtype=jnp.float32)
        q_mat, _ = jnp.linalg.qr(g)
        blocks.append(q_mat.T[:remaining])
    final = jnp.concatenate(blocks, axis=0)

    if scaling == 0:
        multiplier = jnp.linalg.norm(
            jax.random.normal(keys[-1], (nb_rows, nb_columns), dtype=jnp.float32),
            axis=1)
    elif scaling == 1:
        multiplier = math.sqrt(float(nb_columns)) * jnp.ones((nb_rows,), jnp.float32)
    else:
        raise ValueError(f"Invalid scaling {scaling}")
    return multiplier[:, None] * final


# ----------------------------------------------------------------------------
# Kernels
# ----------------------------------------------------------------------------
def _phase1_kernel(q_ref, k_ref, proj_ref, qout_ref, kphi_ref, lmax_ref, *,
                   n_rows, n_feat, tile_rows, diag_scale, ratio, eps,
                   mask_cols, mask_rows):
    # q_ref/k_ref: (TR, D); proj_ref: (D, Mpad) with D**-0.25 already folded in.
    # qout_ref: (TR, Mpad) out dtype; kphi_ref: (TR, Mpad) f32; lmax_ref: (1,1,1) f32.
    x_q = q_ref[...]
    x_k = k_ref[...]
    proj = proj_ref[...]

    dd_q = jnp.dot(x_q, proj, preferred_element_type=jnp.float32)   # (TR, Mpad)
    dd_k = jnp.dot(x_k, proj, preferred_element_type=jnp.float32)   # (TR, Mpad)

    xf_q = x_q.astype(jnp.float32)
    xf_k = x_k.astype(jnp.float32)
    diag_q = jnp.sum(xf_q * xf_q, axis=-1, keepdims=True) * diag_scale   # (TR, 1)
    diag_k = jnp.sum(xf_k * xf_k, axis=-1, keepdims=True) * diag_scale   # (TR, 1)

    # Padded feature columns / padded rows must not influence the max
    # stabilisers; mask them to a huge negative (exp underflows to 0).
    if mask_cols:
        col_ok = jax.lax.broadcasted_iota(jnp.int32, dd_q.shape, 1) < n_feat
        dd_q = jnp.where(col_ok, dd_q, _NEG_BIG)
        dd_k = jnp.where(col_ok, dd_k, _NEG_BIG)
    if mask_rows:
        row_ids = pl.program_id(0) * tile_rows + jax.lax.broadcasted_iota(
            jnp.int32, dd_k.shape, 0)
        dd_k = jnp.where(row_ids < n_rows, dd_k, _NEG_BIG)

    # ---- query feature map: per-row max stabiliser, final output here ----
    q_rowmax = jnp.max(dd_q, axis=-1, keepdims=True)                # (TR, 1)
    q_off = diag_q + q_rowmax
    qout_ref[...] = ((jnp.exp(dd_q - q_off) + eps) * ratio).astype(qout_ref.dtype)

    # ---- key feature map: block-local max stabiliser; global fix in pass 2 ----
    k_rowmax = jnp.max(dd_k, axis=-1, keepdims=True)                # (TR, 1)
    lmax = jnp.max(k_rowmax, axis=0, keepdims=True)                 # (1, 1)
    k_off = diag_k + lmax
    kphi_ref[...] = jnp.exp(dd_k - k_off)                           # f32, <= 1
    lmax_ref[...] = lmax.reshape(1, 1, 1)


def _k_rescale_kernel(scale_ref, phi_ref, out_ref, *, ratio_eps):
    # scale_ref: (T,) f32 in SMEM (scalar prefetch); phi/out: (TR, Mpad).
    # out = ratio*exp(dd - diag - gmax) + ratio*eps
    #     = phi_local * (ratio*exp(lmax - gmax)) + ratio*eps
    s = scale_ref[pl.program_id(0)]
    out_ref[...] = (phi_ref[...] * s + ratio_eps).astype(out_ref.dtype)


# ----------------------------------------------------------------------------
# Wrapper module
# ----------------------------------------------------------------------------
class FeatureMapPallas:
    def __init__(self, dim_heads, nb_features=None, ortho_scaling=0, key=None,
                 row_tile=512):
        if nb_features is None:
            nb_features = int(dim_heads * math.log(dim_heads))
        self.dim_heads = dim_heads
        self.nb_features = nb_features
        self.row_tile = row_tile
        if key is None:
            key = jax.random.PRNGKey(42)
        # Raw buffer (matches the torch module's projection_matrix semantics).
        self.projection_matrix = gaussian_orthogonal_random_matrix(
            key, nb_features, dim_heads, scaling=ortho_scaling)        # (M, D)

        # Pre-processed MXU operand (one-time, at init):
        #  * fold D**-0.25 into the projection,
        #  * transpose so the kernel matmul is x @ projT,
        #  * zero-pad features up to a lane multiple (128) for lane-dense
        #    matmul N-dim and unmasked output stores.
        data_norm = float(dim_heads) ** -0.25
        m_pad = _round_up(nb_features, 128)
        proj_t = (self.projection_matrix * data_norm).T                # (D, M)
        if m_pad != nb_features:
            proj_t = jnp.pad(proj_t, ((0, 0), (0, m_pad - nb_features)))
        self._proj_t = proj_t.astype(jnp.float32)                      # (D, Mpad)
        self._m_pad = m_pad
        self._diag_scale = 0.5 * data_norm * data_norm                 # 0.5 / sqrt(D)
        self._ratio = float(nb_features) ** -0.5

    def __call__(self, q, k):
        B, H, S, D = q.shape
        assert D == self.dim_heads
        M, Mp = self.nb_features, self._m_pad
        R = B * H * S
        TR = min(self.row_tile, _round_up(R, 8))
        Rp = _round_up(R, TR)
        T = Rp // TR

        qf = q.reshape(R, D)
        kf = k.reshape(R, D)
        if Rp != R:
            qf = jnp.pad(qf, ((0, Rp - R), (0, 0)))
            kf = jnp.pad(kf, ((0, Rp - R), (0, 0)))
        proj = self._proj_t.astype(q.dtype)

        cparams = pltpu.CompilerParams(
            dimension_semantics=("parallel",),
            vmem_limit_bytes=32 * 1024 * 1024)

        kern1 = partial(
            _phase1_kernel,
            n_rows=R, n_feat=M, tile_rows=TR,
            diag_scale=self._diag_scale, ratio=self._ratio, eps=EPS,
            mask_cols=(Mp != M), mask_rows=(Rp != R))

        # ---- pass 1: both feature maps in one call (shared projection) ----
        q_pad, k_phi, lmax = pl.pallas_call(
            kern1,
            out_shape=(
                jax.ShapeDtypeStruct((Rp, Mp), q.dtype),      # final q features
                jax.ShapeDtypeStruct((Rp, Mp), jnp.float32),  # k phi (local max)
                jax.ShapeDtypeStruct((T, 1, 1), jnp.float32), # per-tile local max
            ),
            grid=(T,),
            in_specs=[
                pl.BlockSpec((TR, D), lambda i: (i, 0)),
                pl.BlockSpec((TR, D), lambda i: (i, 0)),
                pl.BlockSpec((D, Mp), lambda i: (0, 0)),
            ],
            out_specs=(
                pl.BlockSpec((TR, Mp), lambda i: (i, 0)),
                pl.BlockSpec((TR, Mp), lambda i: (i, 0)),
                pl.BlockSpec((1, 1, 1), lambda i: (i, 0, 0)),
            ),
            compiler_params=cparams,
        )(qf, kf, proj)

        # Tiny (T,)-sized glue: global key max and per-tile rescale factors.
        lmax_v = lmax.reshape(T)
        gmax = jnp.max(lmax_v)
        scales = (self._ratio * jnp.exp(lmax_v - gmax)).astype(jnp.float32)

        # ---- pass 2: per-tile scalar rescale of the key features ----
        k_pad = pl.pallas_call(
            partial(_k_rescale_kernel, ratio_eps=self._ratio * EPS),
            out_shape=jax.ShapeDtypeStruct((Rp, Mp), k.dtype),
            grid_spec=pltpu.PrefetchScalarGridSpec(
                num_scalar_prefetch=1,
                grid=(T,),
                in_specs=[pl.BlockSpec((TR, Mp), lambda i, s: (i, 0))],
                out_specs=pl.BlockSpec((TR, Mp), lambda i, s: (i, 0)),
            ),
            compiler_params=cparams,
        )(scales, k_phi)

        q_out = q_pad[:R, :M].reshape(B, H, S, M)
        k_out = k_pad[:R, :M].reshape(B, H, S, M)
        return q_out, k_out


# ----------------------------------------------------------------------------
# Pure-JAX reference of the PyTorch softmax_kernel (sanity check)
# ----------------------------------------------------------------------------
def softmax_kernel_ref(data, proj, is_query, eps=EPS):
    d = data.shape[-1]
    data_norm = float(d) ** -0.25
    ratio = float(proj.shape[0]) ** -0.5
    dd = jnp.einsum('bhid,jd->bhij', data_norm * data, proj)
    diag = jnp.sum(data ** 2, axis=-1, keepdims=True) * 0.5 * data_norm ** 2
    if is_query:
        out = ratio * (jnp.exp(dd - diag - jnp.max(dd, axis=-1, keepdims=True)) + eps)
    else:
        out = ratio * (jnp.exp(dd - diag - jnp.max(dd)) + eps)
    return out


if __name__ == "__main__":
    B, H, S, D = 2, 4, 8, 16          # small shapes consistent with the module
    key = jax.random.PRNGKey(0)
    kq, kk, kp = jax.random.split(key, 3)
    q = jax.random.normal(kq, (B, H, S, D), dtype=jnp.float32)
    k = jax.random.normal(kk, (B, H, S, D), dtype=jnp.float32)

    fmap = FeatureMapPallas(dim_heads=D, key=kp)   # nb_features = int(D*log(D)) = 44

    q_phi, k_phi = fmap(q, k)
    q_phi, k_phi = jax.block_until_ready((q_phi, k_phi))

    # Sanity check against the pure-JAX reference.
    q_ref = softmax_kernel_ref(q, fmap.projection_matrix, is_query=True)
    k_ref = softmax_kernel_ref(k, fmap.projection_matrix, is_query=False)
    assert q_phi.shape == (B, H, S, fmap.nb_features)
    assert k_phi.shape == (B, H, S, fmap.nb_features)
    assert jnp.allclose(q_phi, q_ref, rtol=1e-2, atol=1e-2), "q feature map mismatch"
    assert jnp.allclose(k_phi, k_ref, rtol=1e-2, atol=1e-2), "k feature map mismatch"

    print("KERNEL_OK")
</pallas_src>

<mosaic_0001>
module attributes {stable_mosaic.version = 11 : i64} {
  func.func @_phase1_kernel(%arg0: i32, %arg1: memref<64x16xf32, #tpu.memory_space<vmem>>, %arg2: memref<64x16xf32, #tpu.memory_space<vmem>>, %arg3: memref<16x128xf32, #tpu.memory_space<vmem>>, %arg4: memref<64x128xf32, #tpu.memory_space<vmem>>, %arg5: memref<64x128xf32, #tpu.memory_space<vmem>>, %arg6: memref<1x1x1xf32, #tpu.memory_space<vmem>>) attributes {dimension_semantics = [#tpu.dimension_semantics<parallel>], iteration_bounds = array<i64: 1>, scalar_prefetch = 0 : i64, scratch_operands = 0 : i64, tpu.core_type = #tpu.core_type<tc>, window_params = [{transform_indices = @transform_0, window_bounds = array<i64: 64, 16>}, {transform_indices = @transform_1, window_bounds = array<i64: 64, 16>}, {pipeline_mode = #tpu.pipeline_mode<synchronous>, transform_indices = @transform_2, window_bounds = array<i64: 16, 128>}, {transform_indices = @transform_3, window_bounds = array<i64: 64, 128>}, {transform_indices = @transform_4, window_bounds = array<i64: 64, 128>}, {transform_indices = @transform_5, window_bounds = array<i64: 1, 1, 1>}]} {
    %c0 = arith.constant 0 : index
    %c0_0 = arith.constant 0 : index
    %0 = vector.load %arg1[%c0, %c0_0] : memref<64x16xf32, #tpu.memory_space<vmem>>, vector<64x16xf32>
    %c0_1 = arith.constant 0 : index
    %c0_2 = arith.constant 0 : index
    %1 = vector.load %arg2[%c0_1, %c0_2] : memref<64x16xf32, #tpu.memory_space<vmem>>, vector<64x16xf32>
    %c0_3 = arith.constant 0 : index
    %c0_4 = arith.constant 0 : index
    %2 = vector.load %arg3[%c0_3, %c0_4] : memref<16x128xf32, #tpu.memory_space<vmem>>, vector<16x128xf32>
    %cst = arith.constant dense<0.000000e+00> : vector<64x128xf32>
    %3 = tpu.matmul %0, %2, %cst {dimension_numbers = #tpu.dot_dimension_numbers<[1], [0], [0], [1], [0, 0, 1, 1], [], []>} : vector<64x16xf32>, vector<16x128xf32>, vector<64x128xf32> -> vector<64x128xf32>
    %cst_5 = arith.constant dense<0.000000e+00> : vector<64x128xf32>
    %4 = tpu.matmul %1, %2, %cst_5 {dimension_numbers = #tpu.dot_dimension_numbers<[1], [0], [0], [1], [0, 0, 1, 1], [], []>} : vector<64x16xf32>, vector<16x128xf32>, vector<64x128xf32> -> vector<64x128xf32>
    %5 = arith.mulf %0, %0 : vector<64x16xf32>
    %cst_6 = arith.constant dense<0.000000e+00> : vector<64xf32>
    %6 = vector.multi_reduction <add>, %5, %cst_6 [1] : vector<64x16xf32> to vector<64xf32>
    %7 = vector.shape_cast %6 : vector<64xf32> to vector<64x1xf32>
    %cst_7 = arith.constant 1.250000e-01 : f32
    %8 = vector.broadcast %cst_7 : f32 to vector<64x1xf32>
    %9 = arith.mulf %7, %8 : vector<64x1xf32>
    %10 = arith.mulf %1, %1 : vector<64x16xf32>
    %cst_8 = arith.constant dense<0.000000e+00> : vector<64xf32>
    %11 = vector.multi_reduction <add>, %10, %cst_8 [1] : vector<64x16xf32> to vector<64xf32>
    %12 = vector.shape_cast %11 : vector<64xf32> to vector<64x1xf32>
    %cst_9 = arith.constant 1.250000e-01 : f32
    %13 = vector.broadcast %cst_9 : f32 to vector<64x1xf32>
    %14 = arith.mulf %12, %13 : vector<64x1xf32>
    %15 = tpu.iota {dimensions = array<i32: 1>} : vector<64x128xi32>
    %c44_i32 = arith.constant 44 : i32
    %16 = vector.broadcast %c44_i32 : i32 to vector<64x128xi32>
    %17 = arith.cmpi slt, %15, %16 : vector<64x128xi32>
    %cst_10 = arith.constant -1.000000e+30 : f32
    %18 = vector.broadcast %cst_10 : f32 to vector<64x128xf32>
    %19 = arith.select %17, %3, %18 : vector<64x128xi1>, vector<64x128xf32>
    %cst_11 = arith.constant -1.000000e+30 : f32
    %20 = vector.broadcast %cst_11 : f32 to vector<64x128xf32>
    %21 = arith.select %17, %4, %20 : vector<64x128xi1>, vector<64x128xf32>
    %cst_12 = arith.constant dense<0xFF800000> : vector<64xf32>
    %22 = vector.multi_reduction <maximumf>, %19, %cst_12 [1] : vector<64x128xf32> to vector<64xf32>
    %23 = vector.shape_cast %22 : vector<64xf32> to vector<64x1xf32>
    %24 = arith.addf %9, %23 : vector<64x1xf32>
    %25 = vector.broadcast %24 : vector<64x1xf32> to vector<64x128xf32>
    %26 = arith.subf %19, %25 : vector<64x128xf32>
    %27 = math.exp %26 : vector<64x128xf32>
    %cst_13 = arith.constant 9.99999974E-5 : f32
    %28 = vector.broadcast %cst_13 : f32 to vector<64x128xf32>
    %29 = arith.addf %27, %28 : vector<64x128xf32>
    %cst_14 = arith.constant 0.150755674 : f32
    %30 = vector.broadcast %cst_14 : f32 to vector<64x128xf32>
    %31 = arith.mulf %29, %30 : vector<64x128xf32>
    %c0_15 = arith.constant 0 : index
    %c0_16 = arith.constant 0 : index
    %32 = vector.load %arg4[%c0_15, %c0_16] : memref<64x128xf32, #tpu.memory_space<vmem>>, vector<64x128xf32>
    tpu.vector_store %arg4[%c0_15, %c0_16], %31 {strides = array<i32>} : memref<64x128xf32, #tpu.memory_space<vmem>>, vector<64x128xf32>,
    %cst_17 = arith.constant dense<0xFF800000> : vector<64xf32>
    %33 = vector.multi_reduction <maximumf>, %21, %cst_17 [1] : vector<64x128xf32> to vector<64xf32>
    %34 = vector.shape_cast %33 : vector<64xf32> to vector<64x1xf32>
    %cst_18 = arith.constant dense<0xFF800000> : vector<1xf32>
    %35 = vector.multi_reduction <maximumf>, %34, %cst_18 [0] : vector<64x1xf32> to vector<1xf32>
    %36 = vector.shape_cast %35 : vector<1xf32> to vector<1x1xf32>
    %37 = vector.broadcast %36 : vector<1x1xf32> to vector<64x1xf32>
    %38 = arith.addf %14, %37 : vector<64x1xf32>
    %39 = vector.broadcast %38 : vector<64x1xf32> to vector<64x128xf32>
    %40 = arith.subf %21, %39 : vector<64x128xf32>
    %41 = math.exp %40 : vector<64x128xf32>
    %c0_19 = arith.constant 0 : index
    %c0_20 = arith.constant 0 : index
    %42 = vector.load %arg5[%c0_19, %c0_20] : memref<64x128xf32, #tpu.memory_space<vmem>>, vector<64x128xf32>
    tpu.vector_store %arg5[%c0_19, %c0_20], %41 {strides = array<i32>} : memref<64x128xf32, #tpu.memory_space<vmem>>, vector<64x128xf32>,
    %43 = vector.shape_cast %36 : vector<1x1xf32> to vector<1x1x1xf32>
    %c0_21 = arith.constant 0 : index
    %c0_22 = arith.constant 0 : index
    %c0_23 = arith.constant 0 : index
    %44 = vector.load %arg6[%c0_21, %c0_22, %c0_23] : memref<1x1x1xf32, #tpu.memory_space<vmem>>, vector<1x1x1xf32>
    tpu.vector_store %arg6[%c0_21, %c0_22, %c0_23], %43 {strides = array<i32>} : memref<1x1x1xf32, #tpu.memory_space<vmem>>, vector<1x1x1xf32>,
    return
  }
  func.func @transform_0(%arg0: i32) -> (i32, i32) {
    %c0_i32 = arith.constant 0 : i32
    %c0_i32_0 = arith.constant 0 : i32
    return %arg0, %c0_i32 : i32, i32
  }
  func.func @transform_1(%arg0: i32) -> (i32, i32) {
    %c0_i32 = arith.constant 0 : i32
    %c0_i32_0 = arith.constant 0 : i32
    return %arg0, %c0_i32 : i32, i32
  }
  func.func @transform_2(%arg0: i32) -> (i32, i32) {
    %c0_i32 = arith.constant 0 : i32
    %c0_i32_0 = arith.constant 0 : i32
    %c0_i32_1 = arith.constant 0 : i32
    return %c0_i32, %c0_i32_0 : i32, i32
  }
  func.func @transform_3(%arg0: i32) -> (i32, i32) {
    %c0_i32 = arith.constant 0 : i32
    %c0_i32_0 = arith.constant 0 : i32
    return %arg0, %c0_i32 : i32, i32
  }
  func.func @transform_4(%arg0: i32) -> (i32, i32) {
    %c0_i32 = arith.constant 0 : i32
    %c0_i32_0 = arith.constant 0 : i32
    return %arg0, %c0_i32 : i32, i32
  }
  func.func @transform_5(%arg0: i32) -> (i32, i32, i32) {
    %c0_i32 = arith.constant 0 : i32
    %c0_i32_0 = arith.constant 0 : i32
    %c0_i32_1 = arith.constant 0 : i32
    return %arg0, %c0_i32, %c0_i32_0 : i32, i32, i32
  }
}

</mosaic_0001>

<bundles_post_ra>
// kernel: tpu_custom_call.1
= control target key start
LH: loop header
LB: loop body
LE: loop exit
PB: predicated region body
PF: predicated region fallthrough
CT: control target
= control target key end

     0   :  { %11 = vsyncpa [#allocation3], 0  ;;  %vm37_vm0 = vcmask 130048   ;;  %s860_s0 = inlined_call_operand.vmem [shape: f32[64,16], index: 0, kind: input, shape index: {}]   ;;  %s861_s1 = inlined_call_operand.vmem [shape: f32[64,16], index: 1, kind: input, shape index: {}]   ;;  %s862_s2 = inlined_call_operand.vmem [shape: f32[16,128], index: 2, kind: input, shape index: {}]   ;;  %s863_s3 = inlined_call_operand.hbm [shape: f32[64,128], index: 3, kind: output, shape index: {0}]   ;;  %s864_s4 = inlined_call_operand.hbm [shape: f32[64,128], index: 4, kind: output, shape index: {1}]   ;;  %s865_s5 = inlined_call_operand.hbm [shape: f32[1,1,1], index: 5, kind: output, shape index: {2}]  }
   0x1   :  { %v36_v0 = vld [vmem:[%s862_s2 + $0x8] sm:$0xff]  ;;  %v35_v1 = vld [vmem:[%s862_s2] sm:$0xff]  ;;  %v21_v9 = vld [vmem:[%s860_s0 + $0x10] sm:$0xff] }
   0x2   :  { %v19_v2 = vld [vmem:[%s860_s0] sm:$0xff]  ;;  %76 = vmatpush.msra.mxu0 %v36_v0  ;;  %141 = vmatpush.msra.mxu1 %v36_v0  ;;  %v170_v11 = vmul.f32 %v21_v9, %v21_v9  ;;  %v20_v12 = vld [vmem:[%s860_s0 + $0x8] sm:$0xff] }
   0x3   :  { %v23_v3 = vld [vmem:[%s860_s0 + $0x20] sm:$0xff]  ;;  %v168_v4 = vmul.f32 %v19_v2, %v19_v2  ;;  %479 = vmatpush.msra.mxu3 %v36_v0  ;;  %477 = vmatpush.msra.mxu2 %v36_v0 }
   0x4   :  { %v644_v5 = vld [vmem:[%s861_s1] sm:$0xff]  ;;  %v172_v7 = vmul.f32 %v23_v3, %v23_v3  ;;  %77 = vmatpush.msra.mxu0 %v35_v1  ;;  %142 = vmatpush.msra.mxu1 %v35_v1 }
   0x5   :  { %v649_v6 = vld [vmem:[%s861_s1 + $0x20] sm:$0xff]  ;;  %v176_v8 = vsel %vm37_vm0, %v168_v4, 0.0  ;;  %480 = vmatpush.msra.mxu3 %v35_v1  ;;  %461 = vmatmul.msk.f32.vlgmr.msra.gmra.mxu0 %vm37_vm0, %v19_v2 }
   0x6   :  { %v188_v10 = vsel %vm37_vm0, %v172_v7, 0.0  ;;  %469 = vmatmul.msk.f32.vlgmr.msra.gmra.mxu1 %vm37_vm0, %v644_v5  ;;  %473 = vmatmul.msk.f32.vlgmr.msra.gmra.mxu3 %vm37_vm0, %v649_v6 }
   0x7   :  { %478 = vmatpush.msra.mxu2 %v35_v1  ;;  %177 = vadd.xlane.f32.xlu0 %v176_v8 }
   0x8   :  { %12 = vsyncpa [#allocation5], 0  ;;  %465 = vmatmul.msk.f32.vlgmr.msra.gmra.mxu2 %vm37_vm0, %v23_v3  ;;  %v24_v13 = vld [vmem:[%s860_s0 + $0x28] sm:$0xff]  ;;  %v182_v14 = vsel %vm37_vm0, %v170_v11, 0.0  ;;  %189 = vadd.xlane.f32.xlu2 %v188_v10  ;;  %v169_v15 = vmul.f32 %v20_v12, %v20_v12  ;;  %v22_v16 = vld [vmem:[%s860_s0 + $0x18] sm:$0xff]  ;;  %v208_v38 = vmul.f32 %v644_v5, %v644_v5  ;;  %v248_v40 = vlaneseq  ;;  %s416_s29 = sshll.u32 %s863_s3, 4  ;;  %s417_s29 = int_to_ptr.hbm [resolvable:$true] %s416_s29 }
   0x9   :  { %183 = vadd.xlane.f32.xlu1 %v182_v14  ;;  %v173_v17 = vmul.f32 %v24_v13, %v24_v13  ;;  %v171_v18 = vmul.f32 %v22_v16, %v22_v16  ;;  %v675_v19 = vld [vmem:[%s861_s1 + $0x28] sm:$0xff]  ;;  %v25_v24 = vld [vmem:[%s860_s0 + $0x30] sm:$0xff]  ;;  %v26_v27 = vld [vmem:[%s860_s0 + $0x38] sm:$0xff]  ;;  %vm408_vm2 = vcmask 0   ;;  %s595_s3 = smov 128   ;;  %s596_s30 = smov 8  }
   0xa   :  { %v28_v20 = vld [vmem:[%s861_s1 + $0x8] sm:$0xff]  ;;  %v179_v21 = vsel %vm37_vm0, %v169_v15, 0.0  ;;  %v29_v25 = vld [vmem:[%s861_s1 + $0x10] sm:$0xff]  ;;  %v174_v26 = vmul.f32 %v25_v24, %v25_v24  ;;  %v175_v29 = vmul.f32 %v26_v27, %v26_v27  ;;  %v30_v35 = vld [vmem:[%s861_s1 + $0x18] sm:$0xff]  ;;  %v216_v39 = vsel %vm37_vm0, %v208_v38, 0.0  ;;  %s597_s6 = smov [#allocation4]  }
   0xb   :  { %v191_v22 = vsel %vm37_vm0, %v173_v17, 0.0  ;;  %v185_v23 = vsel %vm37_vm0, %v171_v18, 0.0  ;;  %v210_v28 = vmul.f32 %v29_v25, %v29_v25  ;;  %v700_v30 = vld [vmem:[%s861_s1 + $0x30] sm:$0xff]  ;;  %v209_v34 = vmul.f32 %v28_v20, %v28_v20  ;;  %v716_v36 = vld [vmem:[%s861_s1 + $0x38] sm:$0xff]  ;;  %s594_s1 = smov [#allocation2]   ;;  %s427_s7 = sshll.u32 %s597_s6, 4  ;;  %s428_s7 = int_to_ptr.vmem [resolvable:$true] %s427_s7 }
   0xc   :  { %v194_v31 = vsel %vm37_vm0, %v174_v26, 0.0  ;;  %v197_v33 = vsel %vm37_vm0, %v175_v29, 0.0  ;;  %v249_v41 = vand.u32 127, %v248_v40  ;;  %v211_v11 = vmul.f32 %v30_v35, %v30_v35  ;;  %s830_s27 = sshll.u32 %s594_s1, 4  ;;  %s429_s10 = sshll.u32 %s864_s4, 4  ;;  %s415_s27 = int_to_ptr.vmem [resolvable:$true] %s830_s27  ;;  %s430_s10 = int_to_ptr.hbm [resolvable:$true] %s429_s10 }
   0xd   :  { %462 = vmatmul.msk.f32.gmra.mxu0 %vm37_vm0, %v20_v12  ;;  %v222_v32 = vsel %vm37_vm0, %v210_v28, 0.0  ;;  %v219_v37 = vsel %vm37_vm0, %v209_v34, 0.0  ;;  %v212_v12 = vmul.f32 %v649_v6, %v649_v6  ;;  %v214_v17 = vmul.f32 %v700_v30, %v700_v30  ;;  %s598_s11 = smov [#allocation6]   ;;  %s443_s15 = sshll.u32 %s865_s5, 4  ;;  %s444_s15 = int_to_ptr.hbm [resolvable:$true] %s443_s15 }
   0xe   :  { %474 = vmatmul.msk.f32.gmra.mxu3 %vm37_vm0, %v675_v19  ;;  %470 = vmatmul.msk.f32.gmra.mxu1 %vm37_vm0, %v28_v20  ;;  %vm250_vm1 = vcmp.lt.s32.totalorder %v249_v41, 44  ;;  %v225_v14 = vsel %vm37_vm0, %v211_v11, 0.0  ;;  %v215_v18 = vmul.f32 %v716_v36, %v716_v36  ;;  %s441_s12 = sshll.u32 %s598_s11, 4  ;;  %s442_s12 = int_to_ptr.vmem [resolvable:$true] %s441_s12 }
   0xf   :  { %180 = vadd.xlane.f32.xlu0 %v179_v21  ;;  %v228_v15 = vsel %vm37_vm0, %v212_v12, 0.0  ;;  %v234_v6 = vsel %vm37_vm0, %v214_v17, 0.0 }
  0x10   :  { %466 = vmatmul.msk.f32.gmra.mxu2 %vm37_vm0, %v24_v13  ;;  %192 = vadd.xlane.f32.xlu2 %v191_v22  ;;  %v213_v13 = vmul.f32 %v675_v19, %v675_v19  ;;  %v237_v20 = vsel %vm37_vm0, %v215_v18, 0.0 }
  0x11   :  { %186 = vadd.xlane.f32.xlu1 %v185_v23 }
  0x15   :  { %463 = vmatmul.msk.f32.gmra.mxu0 %vm37_vm0, %v21_v9 }
  0x16   :  { %475 = vmatmul.msk.f32.gmra.mxu3 %vm37_vm0, %v700_v30  ;;  %471 = vmatmul.msk.f32.gmra.mxu1 %vm37_vm0, %v29_v25 }
  0x17   :  { %195 = vadd.xlane.f32.xlu0 %v194_v31 }
  0x18   :  { %467 = vmatmul.msk.f32.gmra.mxu2 %vm37_vm0, %v25_v24  ;;  %223 = vadd.xlane.f32.xlu2 %v222_v32 }
  0x19   :  { %198 = vadd.xlane.f32.xlu1 %v197_v33 }
  0x1d   :  { %464 = vmatmul.msk.f32.gmra.mxu0 %vm37_vm0, %v22_v16  ;;  %v231_v16 = vsel %vm37_vm0, %v213_v13, 0.0 }
  0x1e   :  { %472 = vmatmul.msk.f32.gmra.mxu1 %vm37_vm0, %v30_v35  ;;  %476 = vmatmul.msk.f32.gmra.mxu3 %vm37_vm0, %v716_v36 }
  0x1f   :  { %217 = vadd.xlane.f32.xlu0 %v216_v39 }
  0x20   :  { %468 = vmatmul.msk.f32.gmra.mxu2 %vm37_vm0, %v26_v27 }
  0x21   :  { %220 = vadd.xlane.f32.xlu1 %v219_v37 }
  0x7a   :  { %v178_v21 = vpop.xlane.xlu0 %177 }
  0x7b   :  { %v190_v23 = vpop.xlane.xlu2 %189  ;;  %v200_v31 = vmul.f32 0.125, %v178_v21 }
  0x7c   :  { %v184_v19 = vpop.xlane.xlu1 %183  ;;  %v204_v38 = vmul.f32 0.125, %v190_v23 }
  0x82   :  { %v79_v42 = vpop.f32.mrf.mxu0  ;;  %v181_v24 = vpop.xlane.xlu0 %180 }
  0x83   :  { %v144_v43 = vpop.f32.mrf.mxu1  ;;  %v728_v44 = vsel %vm250_vm1, %v79_v42, -1e+30  ;;  %v193_v26 = vpop.xlane.xlu2 %192 }
  0x84   :  { %v731_v45 = vsel %vm250_vm1, %v144_v43, -1e+30  ;;  %267 = vmax.xlane.f32.xlu1 %v728_v44  ;;  %v804_v22 = vpop.xlane.xlu1 %186 }
  0x85   :  { %339 = vmax.xlane.f32.xlu2 %v731_v45 }
  0x89   :  { %v156_v46 = vpop.f32.mrf.mxu3 }
  0x8a   :  { %v736_v47 = vsel %vm250_vm1, %v156_v46, -1e+30  ;;  %v82_v51 = vpop.f32.mrf.mxu0  ;;  %v196_v27 = vpop.xlane.xlu0 %195 }
  0x8b   :  { %v91_v48 = vpop.f32.mrf.mxu2  ;;  %347 = vmax.xlane.f32.xlu0 %v736_v47  ;;  %v147_v49 = vpop.f32.mrf.mxu1  ;;  %v750_v55 = vsel %vm250_vm1, %v82_v51, -1e+30  ;;  %v201_v51 = vmul.f32 0.125, %v181_v24 }
  0x8c   :  { %v740_v50 = vsel %vm250_vm1, %v91_v48, -1e+30  ;;  %v744_v52 = vsel %vm250_vm1, %v147_v49, -1e+30  ;;  %v806_v25 = vpop.xlane.xlu1 %198  ;;  %v810_v29 = vpop.xlane.xlu2 %223 }
  0x8d   :  { %275 = vmax.xlane.f32.xlu2 %v740_v50 }
  0x91   :  { %v159_v53 = vpop.f32.mrf.mxu3 }
  0x92   :  { %v747_v54 = vsel %vm250_vm1, %v159_v53, -1e+30  ;;  %v85_v62 = vpop.f32.mrf.mxu0  ;;  %v812_v30 = vpop.xlane.xlu0 %217 }
  0x93   :  { %341 = vmax.xlane.f32.xlu0 %v744_v52  ;;  %349 = vmax.xlane.f32.xlu1 %v747_v54  ;;  %v94_v56 = vpop.f32.mrf.mxu2  ;;  %v150_v57 = vpop.f32.mrf.mxu1  ;;  %v771_v2 = vsel %vm250_vm1, %v85_v62, -1e+30  ;;  %v205_v62 = vmul.f32 0.125, %v193_v26 }
  0x94   :  { %v756_v58 = vsel %vm250_vm1, %v94_v56, -1e+30  ;;  %v759_v59 = vsel %vm250_vm1, %v150_v57, -1e+30  ;;  %v808_v28 = vpop.xlane.xlu1 %220 }
  0x95   :  { %269 = vmax.xlane.f32.xlu2 %v750_v55 }
  0x99   :  { %v162_v60 = vpop.f32.mrf.mxu3 }
  0x9a   :  { %v762_v61 = vsel %vm250_vm1, %v162_v60, -1e+30  ;;  %v88_v4 = vpop.f32.mrf.mxu0 }
  0x9b   :  { %277 = vmax.xlane.f32.xlu0 %v756_v58  ;;  %343 = vmax.xlane.f32.xlu1 %v759_v59  ;;  %v97_v63 = vpop.f32.mrf.mxu2  ;;  %v153_v0 = vpop.f32.mrf.mxu1  ;;  %v783_v9 = vsel %vm250_vm1, %v88_v4, -1e+30 }
  0x9c   :  { %v768_v1 = vsel %vm250_vm1, %v97_v63, -1e+30  ;;  %v774_v3 = vsel %vm250_vm1, %v153_v0, -1e+30 }
  0x9d   :  { %351 = vmax.xlane.f32.xlu2 %v762_v61 }
  0xa1   :  { %v165_v5 = vpop.f32.mrf.mxu3 }
  0xa2   :  { %v780_v8 = vsel %vm250_vm1, %v165_v5, -1e+30 }
  0xa3   :  { %279 = vmax.xlane.f32.xlu1 %v768_v1  ;;  %271 = vmax.xlane.f32.xlu0 %v771_v2  ;;  %v100_v7 = vpop.f32.mrf.mxu2 }
  0xa4   :  { %v786_v10 = vsel %vm250_vm1, %v100_v7, -1e+30 }
  0xa5   :  { %345 = vmax.xlane.f32.xlu2 %v774_v3 }
  0xab   :  { %353 = vmax.xlane.f32.xlu0 %v780_v8  ;;  %273 = vmax.xlane.f32.xlu1 %v783_v9 }
  0xad   :  { %281 = vmax.xlane.f32.xlu2 %v786_v10 }
  0xb3   :  { %226 = vadd.xlane.f32.xlu0 %v225_v14  ;;  %229 = vadd.xlane.f32.xlu1 %v228_v15  ;;  %v202_v15 = vmul.f32 0.125, %v184_v19  ;;  %v203_v19 = vmul.f32 0.125, %v804_v22 }
  0xb5   :  { %232 = vadd.xlane.f32.xlu2 %v231_v16  ;;  %v206_v16 = vmul.f32 0.125, %v196_v27 }
  0xbb   :  { %235 = vadd.xlane.f32.xlu0 %v234_v6  ;;  %238 = vadd.xlane.f32.xlu1 %v237_v20 }
  0xf7   :  { %v268_v32 = vpop.xlane.xlu1 %267 }
  0xf8   :  { %v814_v33 = vpop.xlane.xlu2 %339  ;;  %v283_v34 = vadd.f32 %v268_v32, %v200_v31 }
  0xfa   :  { %v291_v35 = vsub.f32 %v728_v44, %v283_v34 }
  0xfc   :  { %v299_v36 = vmul.f32 1.442695, %v291_v35  ;;  %v207_v35 = vmul.f32 0.125, %v806_v25 }
  0xfe   :  { %486 = vpow2.f32 %v299_v36  ;;  %v817_v37 = vpop.xlane.xlu0 %347 }
 0x100   :  { %v276_v39 = vpop.xlane.xlu2 %275 }
 0x101   :  { %v287_v40 = vadd.f32 %v276_v39, %v204_v38 }
 0x103   :  { %v295_v41 = vsub.f32 %v740_v50, %v287_v40 }
 0x104   :  { %v487_v42 = vpop.eup %486 }
 0x105   :  { %v315_v43 = vadd.f32 0.0001, %v487_v42  ;;  %v307_v46 = vmul.f32 1.442695, %v295_v41 }
 0x106   :  { %v342_v48 = vpop.xlane.xlu0 %341  ;;  %v350_v49 = vpop.xlane.xlu1 %349 }
 0x107   :  { %v323_v53 = vmul.f32 0.15075567, %v315_v43  ;;  %488 = vpow2.f32 %v307_v46  ;;  %v356_v27 = vmax.f32 %v342_v48, %v350_v49 }
 0x108   :  { %v270_v56 = vpop.xlane.xlu2 %269 }
 0x109   :  { %331 = vst [vmem:[#allocation2] sm:$0xff] %v323_v53  ;;  %v284_v44 = vadd.f32 %v270_v56, %v201_v51 }
 0x10b   :  { %v292_v57 = vsub.f32 %v750_v55, %v284_v44 }
 0x10d   :  { %v489_v60 = vpop.eup %488  ;;  %v301_v63 = vmul.f32 1.442695, %v292_v57 }
 0x10e   :  { %v319_v0 = vadd.f32 0.0001, %v489_v60  ;;  %v278_v4 = vpop.xlane.xlu0 %277  ;;  %v344_v5 = vpop.xlane.xlu1 %343 }
 0x10f   :  { %490 = vpow2.f32 %v301_v63  ;;  %v288_v50 = vadd.f32 %v278_v4, %v205_v62 }
 0x110   :  { %v327_v7 = vmul.f32 0.15075567, %v319_v0  ;;  %v352_v11 = vpop.xlane.xlu2 %351 }
 0x111   :  { %v296_v12 = vsub.f32 %v756_v58, %v288_v50  ;;  %v357_v40 = vmax.f32 %v344_v5, %v352_v11 }
 0x112   :  { %335 = vst [vmem:[#allocation2 + $0x20] sm:$0xff] %v327_v7 }
 0x113   :  { %v309_v13 = vmul.f32 1.442695, %v296_v12 }
 0x115   :  { %v491_v14 = vpop.eup %490  ;;  %492 = vpow2.f32 %v309_v13 }
 0x116   :  { %v316_v17 = vadd.f32 0.0001, %v491_v14  ;;  %v280_v55 = vpop.xlane.xlu1 %279  ;;  %v272_v18 = vpop.xlane.xlu0 %271 }
 0x117   :  { %v289_v6 = vadd.f32 %v280_v55, %v206_v16  ;;  %v285_v20 = vadd.f32 %v272_v18, %v202_v15 }
 0x118   :  { %v324_v21 = vmul.f32 0.15075567, %v316_v17  ;;  %v346_v23 = vpop.xlane.xlu2 %345 }
 0x119   :  { %v297_v24 = vsub.f32 %v768_v1, %v289_v6  ;;  %v293_v26 = vsub.f32 %v771_v2, %v285_v20  ;;  %v355_v1 = vmax.f32 %v814_v33, %v817_v37 }
 0x11a   :  { %332 = vst [vmem:[#allocation2 + $0x8] sm:$0xff] %v324_v21 }
 0x11b   :  { %v493_v31 = vpop.eup %492  ;;  %v311_v58 = vmul.f32 1.442695, %v297_v24  ;;  %v303_v32 = vmul.f32 1.442695, %v293_v26  ;;  %v359_v43 = vmax.f32 %v355_v1, %v356_v27  ;;  %v241_v24 = vmul.f32 0.125, %v808_v28 }
 0x11c   :  { %v320_v34 = vadd.f32 0.0001, %v493_v31  ;;  %v240_v26 = vmul.f32 0.125, %v812_v30 }
 0x11d   :  { %494 = vpow2.f32 %v311_v58 }
 0x11e   :  { %v328_v36 = vmul.f32 0.15075567, %v320_v34  ;;  %496 = vpow2.f32 %v303_v32  ;;  %v354_v38 = vpop.xlane.xlu0 %353  ;;  %v274_v39 = vpop.xlane.xlu1 %273 }
 0x11f   :  { %v358_v2 = vmax.f32 %v346_v23, %v354_v38  ;;  %v286_v41 = vadd.f32 %v274_v39, %v203_v19  ;;  %v242_v23 = vmul.f32 0.125, %v810_v29 }
 0x120   :  { %336 = vst [vmem:[#allocation2 + $0x28] sm:$0xff] %v328_v36  ;;  %v282_v42 = vpop.xlane.xlu2 %281 }
 0x121   :  { %v360_v46 = vmax.f32 %v357_v40, %v358_v2  ;;  %v294_v22 = vsub.f32 %v783_v9, %v286_v41  ;;  %v290_v48 = vadd.f32 %v282_v42, %v207_v35 }
 0x123   :  { %v495_v49 = vpop.eup %494  ;;  %v361_v51 = vmax.f32 %v359_v43, %v360_v46  ;;  %v305_v25 = vmul.f32 1.442695, %v294_v22  ;;  %v298_v53 = vsub.f32 %v786_v10, %v290_v48 }
 0x124   :  { %v497_v56 = vpop.eup %496  ;;  %v321_v44 = vadd.f32 0.0001, %v495_v49 }
 0x125   :  { %v317_v57 = vadd.f32 0.0001, %v497_v56  ;;  %v362_v60 = vrot.slane %v361_v51, 4  ;;  %498 = vpow2.f32 %v305_v25  ;;  %v313_v33 = vmul.f32 1.442695, %v298_v53 }
 0x126   :  { %v329_v37 = vmul.f32 0.15075567, %v321_v44  ;;  %v227_v62 = vpop.xlane.xlu0 %226  ;;  %v230_v63 = vpop.xlane.xlu1 %229 }
 0x127   :  { %v325_v0 = vmul.f32 0.15075567, %v317_v57  ;;  %v363_v4 = vmax.f32 %v361_v51, %v362_v60  ;;  %500 = vpow2.f32 %v313_v33  ;;  %v243_v16 = vmul.f32 0.125, %v227_v62 }
 0x128   :  { %337 = vst [vmem:[#allocation2 + $0x30] sm:$0xff] %v329_v37  ;;  %v233_v5 = vpop.xlane.xlu2 %232  ;;  %v244_v6 = vmul.f32 0.125, %v230_v63 }
 0x129   :  { %333 = vst [vmem:[#allocation2 + $0x10] sm:$0xff] %v325_v0  ;;  %v364_v9 = vrot.slane %v363_v4, 2  ;;  %v245_v13 = vmul.f32 0.125, %v233_v5 }
 0x12b   :  { %v499_v50 = vpop.eup %498  ;;  %v365_v7 = vmax.f32 %v363_v4, %v364_v9 }
 0x12c   :  { %v318_v11 = vadd.f32 0.0001, %v499_v50 }
 0x12d   :  { %v501_v10 = vpop.eup %500  ;;  %v366_v12 = vrot.slane %v365_v7, 1 }
 0x12e   :  { %v326_v14 = vmul.f32 0.15075567, %v318_v11  ;;  %v322_v15 = vadd.f32 0.0001, %v501_v10  ;;  %v236_v17 = vpop.xlane.xlu0 %235  ;;  %v239_v55 = vpop.xlane.xlu1 %238 }
 0x12f   :  { %v367_v18 = vmax.f32 %v365_v7, %v366_v12  ;;  %v246_v20 = vmul.f32 0.125, %v236_v17  ;;  %v247_v21 = vmul.f32 0.125, %v239_v55 }
 0x130   :  { %334 = vst [vmem:[#allocation2 + $0x18] sm:$0xff] %v326_v14  ;;  %v330_v31 = vmul.f32 0.15075567, %v322_v15 }
 0x131   :  { %v371_v58 = vadd.f32 %v367_v18, %v243_v16  ;;  %v372_v32 = vadd.f32 %v367_v18, %v244_v6  ;;  %v373_v34 = vadd.f32 %v367_v18, %v245_v13  ;;  %v374_v19 = vadd.f32 %v367_v18, %v246_v20  ;;  %409 = vst.msk [vmem:[#allocation6] sm:$0x1] %vm408_vm2, %v367_v18 }
 0x132   :  { %338 = vst [vmem:[#allocation2 + $0x38] sm:$0xff] %v330_v31  ;;  %v375_v27 = vadd.f32 %v367_v18, %v247_v21  ;;  %v368_v35 = vadd.f32 %v367_v18, %v240_v26  ;;  %v369_v36 = vadd.f32 %v367_v18, %v241_v24  ;;  %v370_v38 = vadd.f32 %v367_v18, %v242_v23 }
 0x133   :  { %v379_v29 = vsub.f32 %v774_v3, %v371_v58  ;;  %v380_v28 = vsub.f32 %v736_v47, %v372_v32  ;;  %v381_v30 = vsub.f32 %v747_v54, %v373_v34  ;;  %v382_v39 = vsub.f32 %v762_v61, %v374_v19  ;;  %422 = dma.vmem_to_hbm [thread:$0]  %s415_s27, 1024, %s417_s29, [#allocation3], %s595_s3, %s595_s3, %s596_s30  }
 0x134   :  { %v383_v1 = vsub.f32 %v780_v8, %v375_v27  ;;  %v376_v40 = vsub.f32 %v731_v45, %v368_v35  ;;  %v377_v3 = vsub.f32 %v744_v52, %v369_v36  ;;  %v378_v54 = vsub.f32 %v759_v59, %v370_v38 }
 0x135   :  { %v390_v2 = vmul.f32 1.442695, %v379_v29  ;;  %v392_v41 = vmul.f32 1.442695, %v380_v28  ;;  %v394_v42 = vmul.f32 1.442695, %v381_v30 }
 0x136   :  { %v396_v47 = vmul.f32 1.442695, %v382_v39  ;;  %v398_v61 = vmul.f32 1.442695, %v383_v1  ;;  %v384_v43 = vmul.f32 1.442695, %v376_v40 }
 0x137   :  { %502 = vpow2.f32 %v390_v2  ;;  %v386_v46 = vmul.f32 1.442695, %v377_v3  ;;  %v388_v22 = vmul.f32 1.442695, %v378_v54 }
 0x138   :  { %504 = vpow2.f32 %v392_v41 }
 0x139   :  { %506 = vpow2.f32 %v394_v42 }
 0x13a   :  { %508 = vpow2.f32 %v396_v47 }
 0x13b   :  { %510 = vpow2.f32 %v398_v61 }
 0x13c   :  { %512 = vpow2.f32 %v384_v43 }
 0x13d   :  { %v503_v8 = vpop.eup %502  ;;  %514 = vpow2.f32 %v386_v46 }
 0x13e   :  { %v505_v45 = vpop.eup %504  ;;  %403 = vst [vmem:[#allocation4 + $0x18] sm:$0xff] %v503_v8  ;;  %516 = vpow2.f32 %v388_v22 }
 0x13f   :  { %v507_v48 = vpop.eup %506  ;;  %404 = vst [vmem:[#allocation4 + $0x20] sm:$0xff] %v505_v45 }
 0x140   :  { %v509_v52 = vpop.eup %508  ;;  %405 = vst [vmem:[#allocation4 + $0x28] sm:$0xff] %v507_v48 }
 0x141   :  { %v511_v59 = vpop.eup %510  ;;  %406 = vst [vmem:[#allocation4 + $0x30] sm:$0xff] %v509_v52 }
 0x142   :  { %v513_v49 = vpop.eup %512  ;;  %407 = vst [vmem:[#allocation4 + $0x38] sm:$0xff] %v511_v59 }
 0x143   :  { %v515_v51 = vpop.eup %514  ;;  %400 = vst [vmem:[#allocation4] sm:$0xff] %v513_v49 }
 0x144   :  { %v517_v25 = vpop.eup %516  ;;  %401 = vst [vmem:[#allocation4 + $0x8] sm:$0xff] %v515_v51 }
 0x145   :  { %402 = vst [vmem:[#allocation4 + $0x10] sm:$0xff] %v517_v25 }
 0x146   :  { %435 = dma.vmem_to_hbm [thread:$0]  %s428_s7, 1024, %s430_s10, [#allocation5], %s595_s3, %s595_s3, %s596_s30  }
 0x147   :  { %446 = dma.vmem_to_hbm [thread:$0]  %s442_s12, 16, %s444_s15, [#allocation5]  }
 0x148   :  { %590 = dma.done.wait [#allocation3], 1024  }
 0x149   :  { %591 = vsyncadd [#allocation3], 4294966272 }
 0x14a   :  { %592 = dma.done.wait [#allocation5], 1040  }
 0x14b   :  { %593 = vsyncadd [#allocation5], 4294966256 }
 0x14c   :  { %459 = vsyncpa [#allocation3], 1 }
 0x14d   :  { %460 = vsyncpa [#allocation5], 1 }

</bundles_post_ra>
